<compile_context>
chip_gen: v5e
topology: v5e:2x2
jax: 0.10.0
libtpu: 0.0.40
codegen_flags: <defaults>
</compile_context>

<pallas_src>
import functools

import jax
import jax.numpy as jnp
from jax.experimental import pallas as pl
from jax.experimental.pallas import tpu as pltpu


def find_multiple(n: int, k: int) -> int:
    if n % k == 0:
        return n
    return n + k - n % k


# ---------------------------------------------------------------------------
# Device introspection (generation-aware VMEM budget / megacore awareness).
# ---------------------------------------------------------------------------
def _tpu_vmem_and_cores():
    vmem_bytes = 64 << 20   # conservative default: v7x-sized VMEM
    num_cores = 1
    try:
        info = pltpu.get_tpu_info()
        cap = getattr(info, "vmem_capacity_bytes", None)
        if cap:
            vmem_bytes = int(cap)
        for attr in ("num_tensorcores", "tensorcore_count", "num_cores",
                     "core_count", "cores_per_chip"):
            v = getattr(info, attr, None)
            if v:
                num_cores = int(v)
                break
    except Exception:
        pass
    if num_cores == 1:
        try:
            v = getattr(jax.devices()[0], "num_cores", None)
            if v:
                num_cores = int(v)
        except Exception:
            pass
    return vmem_bytes, num_cores


# ---------------------------------------------------------------------------
# Tile selection.
# ---------------------------------------------------------------------------
def _vmem_need_bytes(tm, th, D, itemsize):
    w12 = 2 * D * (2 * th) * itemsize      # fused up-proj tile, double-buffered
    w3 = 2 * th * D * itemsize             # down-proj tile, double-buffered
    x_t = 2 * tm * D * itemsize            # x tile (double-buffered)
    o_t = 2 * tm * D * itemsize            # output tile (double-buffered)
    acc = tm * D * 4                       # f32 accumulator scratch
    inter = 3 * tm * th * 4                # (tm, 2*th) f32 h12 + gate temps
    return w12 + w3 + x_t + o_t + acc + inter


def _choose_hidden_tile(H, D, itemsize, budget_bytes):
    """Largest MXU-friendly divisor of H whose weight tiles use <= budget/4.

    Keeping weight tiles small leaves VMEM for a large tm (which is what moves
    the kernel from HBM-bound weight streaming to MXU-bound).
    """
    for c in (512, 384, 256, 128):
        if H % c == 0 and 6 * D * c * itemsize <= budget_bytes // 4:
            return c
    for c in (512, 384, 256, 128):
        if H % c == 0:
            return c
    return H   # ragged hidden dim; only viable for small models


def _choose_tm(M, D, th, itemsize, budget_bytes, num_cores):
    m_ceil = find_multiple(M, 16)          # bf16 sublane packing => tm % 16 == 0
    cap = m_ceil
    if num_cores > 1 and m_ceil >= num_cores * 128:
        # Megacore: keep grid[0] >= num_cores so no TensorCore idles.
        cap = find_multiple(pl.cdiv(M, num_cores), 128)
    base = (2048, 1536, 1024, 896, 768, 640, 512, 384, 256, 128, 64, 32, 16)
    cands = sorted({c for c in base if c <= cap}
                   | ({m_ceil} if m_ceil <= cap else set()),
                   reverse=True)
    if not cands:
        cands = [m_ceil]

    def fits(c):
        return _vmem_need_bytes(c, th, D, itemsize) <= budget_bytes

    tm = next((c for c in cands if fits(c)), cands[-1])
    # Prefer a tile that divides M exactly (avoids a padded HBM copy of x),
    # as long as it is within 2x of the best-fitting tile.
    if M % tm != 0:
        for c in cands:
            if c <= tm and 2 * c >= tm and M % c == 0 and fits(c):
                tm = c
                break
    return tm


# ---------------------------------------------------------------------------
# One-time weight prep (hoisted out of the per-call path).
# ---------------------------------------------------------------------------
def prepare_weights(w1, w2, w3, th=None):
    """Transpose nn.Linear weights to (in, out) and fuse W1/W2 per hidden tile.

    Returns:
      w12: (H // th, D, 2*th)  -- [W1 tile | W2 tile] per hidden tile
      w3t: (H, D)
    """
    H, D = w1.shape
    itemsize = jnp.dtype(w1.dtype).itemsize
    if th is None:
        vmem_bytes, _ = _tpu_vmem_and_cores()
        th = _choose_hidden_tile(H, D, itemsize, int(0.8 * vmem_bytes))
    assert H % th == 0, f"hidden tile {th} must divide n_hidden {H}"
    nh = H // th
    w1t = jnp.transpose(w1).reshape(D, nh, th).transpose(1, 0, 2)   # (nh, D, th)
    w2t = jnp.transpose(w2).reshape(D, nh, th).transpose(1, 0, 2)   # (nh, D, th)
    w12 = jnp.concatenate([w1t, w2t], axis=-1)                      # (nh, D, 2*th)
    w3t = jnp.transpose(w3)                                         # (H, D)
    return w12, w3t


# ---------------------------------------------------------------------------
# Kernel.
# ---------------------------------------------------------------------------
def _mlp_kernel(x_ref, w12_ref, w3_ref, o_ref, acc_ref, *, th):
    # x_ref:  (tm, D)      activations, resident across the h axis
    # w12_ref:(D, 2*th)    fused up-projection tile [W1 | W2]
    # w3_ref: (th, D)      down-projection tile
    # o_ref:  (tm, D)      output tile
    # acc_ref:(tm, D)      f32 accumulator over the hidden (h) grid axis
    h = pl.program_id(1)

    @pl.when(h == 0)
    def _():
        acc_ref[...] = jnp.zeros_like(acc_ref)

    x = x_ref[...]
    # Single fused up-projection dot: (tm, D) x (D, 2*th) -> (tm, 2*th) f32.
    h12 = jnp.dot(x, w12_ref[...], preferred_element_type=jnp.float32)
    h1 = h12[:, :th]          # gate branch   (128-aligned split: free)
    h2 = h12[:, th:]          # linear branch
    # SwiGLU gate in f32 (sigmoid on the EUP, multiplies on the VPU).
    g = (h1 * jax.nn.sigmoid(h1)) * h2
    acc_ref[...] += jnp.dot(g.astype(x_ref.dtype), w3_ref[...],
                            preferred_element_type=jnp.float32)

    @pl.when(h == pl.num_programs(1) - 1)
    def _():
        o_ref[...] = acc_ref[...].astype(o_ref.dtype)


# ---------------------------------------------------------------------------
# Wrapper.
# ---------------------------------------------------------------------------
def llama_mlp(x, w12, w3t, *, tm=None):
    """SwiGLU MLP forward.

    x:   (B, T, D)
    w12: (H // th, D, 2*th)   from prepare_weights
    w3t: (H, D)               from prepare_weights
    returns (B, T, D)
    """
    B, T, D = x.shape
    nh, Dw, two_th = w12.shape
    th = two_th // 2
    H = nh * th
    assert Dw == D and w3t.shape == (H, D), (w12.shape, w3t.shape, x.shape)
    M = B * T
    itemsize = jnp.dtype(x.dtype).itemsize

    vmem_bytes, num_cores = _tpu_vmem_and_cores()
    budget = int(0.8 * vmem_bytes)
    if tm is None:
        tm = _choose_tm(M, D, th, itemsize, budget, num_cores)
    assert tm % 16 == 0 or tm == M, tm

    x2 = x.reshape(M, D)
    m_pad = pl.cdiv(M, tm) * tm
    if m_pad != M:
        # TODO(synk): the ragged last m block could be handled with an in-kernel
        # masked store instead of materializing a padded copy of x in HBM.
        x2 = jnp.pad(x2, ((0, m_pad - M), (0, 0)))

    grid = (m_pad // tm, nh)

    cost = pl.CostEstimate(
        flops=6 * m_pad * D * H,                       # fused up-proj + down-proj
        transcendentals=m_pad * H,                     # sigmoid
        bytes_accessed=2 * m_pad * D * itemsize + grid[0] * 3 * D * H * itemsize,
    )

    need = _vmem_need_bytes(tm, th, D, itemsize)
    # Generation-aware limit: never exceed physical VMEM, keep 16 MiB headroom.
    vmem_limit = int(min(max(need + (16 << 20), 32 << 20), vmem_bytes))

    kernel = functools.partial(_mlp_kernel, th=th)

    out = pl.pallas_call(
        kernel,
        out_shape=jax.ShapeDtypeStruct((m_pad, D), x.dtype),
        grid_spec=pltpu.PrefetchScalarGridSpec(
            num_scalar_prefetch=0,
            grid=grid,
            in_specs=[
                # x block index is invariant along h -> DMA'd once per m tile.
                pl.BlockSpec((tm, D), lambda i, h: (i, 0)),
                # Fused [W1|W2] tile: leading tile axis squeezed in the kernel.
                pl.BlockSpec((None, D, two_th), lambda i, h: (h, 0, 0)),
                pl.BlockSpec((th, D), lambda i, h: (h, 0)),
            ],
            # Lane-dense output: full D (multiple of 128 for real configs).
            out_specs=pl.BlockSpec((tm, D), lambda i, h: (i, 0)),
            scratch_shapes=[pltpu.VMEM((tm, D), jnp.float32)],
        ),
        compiler_params=pltpu.CompilerParams(
            dimension_semantics=("parallel", "arbitrary"),
            vmem_limit_bytes=vmem_limit,
        ),
        cost_estimate=cost,
    )(x2, w12, w3t)

    if m_pad != M:
        out = out[:M]
    return out.reshape(B, T, D)


def reference_mlp(x, w1, w2, w3):
    """Pure-JAX reference matching the PyTorch forward (original weight layout)."""
    h1 = jnp.einsum("btd,hd->bth", x.astype(jnp.float32), w1.astype(jnp.float32))
    h2 = jnp.einsum("btd,hd->bth", x.astype(jnp.float32), w2.astype(jnp.float32))
    g = jax.nn.silu(h1) * h2
    y = jnp.einsum("bth,dh->btd", g, w3.astype(jnp.float32))
    return y.astype(x.dtype)


if __name__ == "__main__":
    # Small config consistent with the module: n_embd=32 -> hidden_dim=128,
    # n_hidden = find_multiple(int(2*128/3), 256) = 256.
    # NOTE: D=32 is a toy width; real LLaMA shapes (D>=4096, H>=11008) are what
    # the generation-aware tiling is sized for.
    n_embd = 32
    hidden_dim = 4 * n_embd
    n_hidden = find_multiple(int(2 * hidden_dim / 3), 256)  # 256

    batch, seq = 2, 8
    dtype = jnp.bfloat16  # TODO(synk): reference config uses torch.float16; bf16 is the TPU-native 16-bit type.

    key = jax.random.PRNGKey(0)
    kx, k1, k2, k3 = jax.random.split(key, 4)
    x = jax.random.normal(kx, (batch, seq, n_embd), dtype=jnp.float32).astype(dtype)
    # nn.Linear weight shapes: (out_features, in_features)
    w1 = (jax.random.normal(k1, (n_hidden, n_embd), dtype=jnp.float32) * 0.02).astype(dtype)
    w2 = (jax.random.normal(k2, (n_hidden, n_embd), dtype=jnp.float32) * 0.02).astype(dtype)
    w3 = (jax.random.normal(k3, (n_embd, n_hidden), dtype=jnp.float32) * 0.02).astype(dtype)

    # One-time weight prep (transpose + W1/W2 fusion), hoisted out of the call path.
    w12, w3t = jax.block_until_ready(prepare_weights(w1, w2, w3))

    y = jax.block_until_ready(llama_mlp(x, w12, w3t))

    y_ref = reference_mlp(x, w1, w2, w3)
    assert y.shape == (batch, seq, n_embd), y.shape
    assert y.dtype == dtype, y.dtype
    err = jnp.max(jnp.abs(y.astype(jnp.float32) - y_ref.astype(jnp.float32)))
    assert float(err) < 1e-2, f"max abs error {float(err)}"

    print("KERNEL_OK")
</pallas_src>

<mosaic_0001>
module attributes {stable_mosaic.version = 11 : i64} {
  func.func @_mlp_kernel(%arg0: i32, %arg1: i32, %arg2: memref<16x32xbf16, #tpu.memory_space<vmem>>, %arg3: memref<1x32x512xbf16, #tpu.memory_space<vmem>>, %arg4: memref<256x32xbf16, #tpu.memory_space<vmem>>, %arg5: memref<16x32xbf16, #tpu.memory_space<vmem>>, %arg6: memref<16x32xf32, #tpu.memory_space<vmem>>) attributes {dimension_semantics = [#tpu.dimension_semantics<parallel>, #tpu.dimension_semantics<arbitrary>], iteration_bounds = array<i64: 1, 1>, scalar_prefetch = 0 : i64, scratch_operands = 1 : i64, tpu.core_type = #tpu.core_type<tc>, window_params = [{transform_indices = @transform_0, window_bounds = array<i64: 16, 32>}, {transform_indices = @transform_1, window_bounds = array<i64: 1, 32, 512>}, {transform_indices = @transform_2, window_bounds = array<i64: 256, 32>}, {transform_indices = @transform_3, window_bounds = array<i64: 16, 32>}]} {
    %c0_i32 = arith.constant 0 : i32
    %0 = arith.cmpi eq, %arg1, %c0_i32 : i32
    %1 = arith.extui %0 : i1 to i32
    %c0_i32_0 = arith.constant 0 : i32
    %2 = arith.cmpi ne, %1, %c0_i32_0 : i32
    scf.if %2 {
      %cst_15 = arith.constant 0.000000e+00 : f32
      %25 = vector.broadcast %cst_15 : f32 to vector<16x32xf32>
      %c0_16 = arith.constant 0 : index
      %c0_17 = arith.constant 0 : index
      %26 = vector.load %arg6[%c0_16, %c0_17] : memref<16x32xf32, #tpu.memory_space<vmem>>, vector<16x32xf32>
      tpu.vector_store %arg6[%c0_16, %c0_17], %25 {strides = array<i32>} : memref<16x32xf32, #tpu.memory_space<vmem>>, vector<16x32xf32>,
    } else {
    }
    %c0 = arith.constant 0 : index
    %c0_1 = arith.constant 0 : index
    %3 = vector.load %arg2[%c0, %c0_1] : memref<16x32xbf16, #tpu.memory_space<vmem>>, vector<16x32xbf16>
    %c0_2 = arith.constant 0 : index
    %c0_3 = arith.constant 0 : index
    %c0_4 = arith.constant 0 : index
    %4 = vector.load %arg3[%c0_2, %c0_3, %c0_4] : memref<1x32x512xbf16, #tpu.memory_space<vmem>>, vector<1x32x512xbf16>
    %5 = vector.shape_cast %4 : vector<1x32x512xbf16> to vector<32x512xbf16>
    %cst = arith.constant dense<0.000000e+00> : vector<16x512xf32>
    %6 = tpu.matmul %3, %5, %cst {dimension_numbers = #tpu.dot_dimension_numbers<[1], [0], [0], [1], [0, 0, 1, 1], [], []>} : vector<16x32xbf16>, vector<32x512xbf16>, vector<16x512xf32> -> vector<16x512xf32>
    %7 = vector.extract_strided_slice %6 {offsets = [0, 0], sizes = [16, 256], strides = [1, 1]} : vector<16x512xf32> to vector<16x256xf32>
    %8 = vector.extract_strided_slice %6 {offsets = [0, 256], sizes = [16, 256], strides = [1, 1]} : vector<16x512xf32> to vector<16x256xf32>
    %9 = arith.negf %7 : vector<16x256xf32>
    %10 = math.exp %9 : vector<16x256xf32>
    %cst_5 = arith.constant 1.000000e+00 : f32
    %11 = vector.broadcast %cst_5 : f32 to vector<16x256xf32>
    %12 = arith.addf %11, %10 : vector<16x256xf32>
    %13 = arith.divf %11, %12 : vector<16x256xf32>
    %14 = arith.mulf %7, %13 : vector<16x256xf32>
    %15 = arith.mulf %14, %8 : vector<16x256xf32>
    %c0_6 = arith.constant 0 : index
    %c0_7 = arith.constant 0 : index
    %16 = vector.load %arg6[%c0_6, %c0_7] : memref<16x32xf32, #tpu.memory_space<vmem>>, vector<16x32xf32>
    %17 = arith.truncf %15 : vector<16x256xf32> to vector<16x256xbf16>
    %c0_8 = arith.constant 0 : index
    %c0_9 = arith.constant 0 : index
    %18 = vector.load %arg4[%c0_8, %c0_9] : memref<256x32xbf16, #tpu.memory_space<vmem>>, vector<256x32xbf16>
    %cst_10 = arith.constant dense<0.000000e+00> : vector<16x32xf32>
    %19 = tpu.matmul %17, %18, %cst_10 {dimension_numbers = #tpu.dot_dimension_numbers<[1], [0], [0], [1], [0, 0, 1, 1], [], []>} : vector<16x256xbf16>, vector<256x32xbf16>, vector<16x32xf32> -> vector<16x32xf32>
    %20 = arith.addf %16, %19 : vector<16x32xf32>
    %c0_11 = arith.constant 0 : index
    %c0_12 = arith.constant 0 : index
    %21 = vector.load %arg6[%c0_11, %c0_12] : memref<16x32xf32, #tpu.memory_space<vmem>>, vector<16x32xf32>
    tpu.vector_store %arg6[%c0_11, %c0_12], %20 {strides = array<i32>} : memref<16x32xf32, #tpu.memory_space<vmem>>, vector<16x32xf32>,
    %c0_i32_13 = arith.constant 0 : i32
    %22 = arith.cmpi eq, %arg1, %c0_i32_13 : i32
    %23 = arith.extui %22 : i1 to i32
    %c0_i32_14 = arith.constant 0 : i32
    %24 = arith.cmpi ne, %23, %c0_i32_14 : i32
    scf.if %24 {
      %c0_15 = arith.constant 0 : index
      %c0_16 = arith.constant 0 : index
      %25 = vector.load %arg6[%c0_15, %c0_16] : memref<16x32xf32, #tpu.memory_space<vmem>>, vector<16x32xf32>
      %26 = arith.truncf %25 : vector<16x32xf32> to vector<16x32xbf16>
      %c0_17 = arith.constant 0 : index
      %c0_18 = arith.constant 0 : index
      %27 = vector.load %arg5[%c0_17, %c0_18] : memref<16x32xbf16, #tpu.memory_space<vmem>>, vector<16x32xbf16>
      tpu.vector_store %arg5[%c0_17, %c0_18], %26 {strides = array<i32>} : memref<16x32xbf16, #tpu.memory_space<vmem>>, vector<16x32xbf16>,
    } else {
    }
    return
  }
  func.func @transform_0(%arg0: i32, %arg1: i32) -> (i32, i32) {
    %c0_i32 = arith.constant 0 : i32
    %c0_i32_0 = arith.constant 0 : i32
    return %arg0, %c0_i32 : i32, i32
  }
  func.func @transform_1(%arg0: i32, %arg1: i32) -> (i32, i32, i32) {
    %c0_i32 = arith.constant 0 : i32
    %c0_i32_0 = arith.constant 0 : i32
    %c0_i32_1 = arith.constant 0 : i32
    return %arg1, %c0_i32, %c0_i32_0 : i32, i32, i32
  }
  func.func @transform_2(%arg0: i32, %arg1: i32) -> (i32, i32) {
    %c0_i32 = arith.constant 0 : i32
    %c0_i32_0 = arith.constant 0 : i32
    return %arg1, %c0_i32 : i32, i32
  }
  func.func @transform_3(%arg0: i32, %arg1: i32) -> (i32, i32) {
    %c0_i32 = arith.constant 0 : i32
    %c0_i32_0 = arith.constant 0 : i32
    return %arg0, %c0_i32 : i32, i32
  }
}

</mosaic_0001>

<bundles_post_ra>
// kernel: tpu_custom_call.1
= control target key start
LH: loop header
LB: loop body
LE: loop exit
PB: predicated region body
PF: predicated region fallthrough
CT: control target
= control target key end

     0   :  { %s755_s0 = inlined_call_operand.vmem [shape: bf16[16,32], index: 0, kind: input, shape index: {}]   ;;  %s756_s1 = inlined_call_operand.vmem [shape: bf16[1,32,512], index: 1, kind: input, shape index: {}]   ;;  %s757_s2 = inlined_call_operand.vmem [shape: bf16[256,32], index: 2, kind: input, shape index: {}]   ;;  %s758_s3 = inlined_call_operand.hbm [shape: bf16[16,32], index: 3, kind: output, shape index: {}]  }
   0x1   :  { %v436_v0 = vld [vmem:[%s756_s1 + $0x20] sm:$0xf]  ;;  %v529_v1 = vld [vmem:[%s756_s1 + $0x2c] sm:$0xf0]  ;;  %v527_v2 = vld [vmem:[%s756_s1 + $0x24] sm:$0xf] }
   0x2   :  { %v437_v3 = vor.u32 %v529_v1, %v436_v0  ;;  %v438_v4 = vld [vmem:[%s756_s1 + $0x30] sm:$0xf0]  ;;  %v420_v5 = vld [vmem:[%s756_s1] sm:$0xf]  ;;  %v525_v6 = vld [vmem:[%s756_s1 + $0xc] sm:$0xf0] }
   0x3   :  { %v441_v7 = vor.u32 %v527_v2, %v438_v4  ;;  %v523_v8 = vld [vmem:[%s756_s1 + $0x4] sm:$0xf]  ;;  %v422_v9 = vld [vmem:[%s756_s1 + $0x10] sm:$0xf0]  ;;  %v421_v10 = vor.u32 %v525_v6, %v420_v5  ;;  %v444_v11 = vld [vmem:[%s756_s1 + $0x28] sm:$0xf] }
   0x4   :  { %88 = vmatpush.bf16.msra.mxu2 %v437_v3  ;;  %v530_v12 = vld [vmem:[%s756_s1 + $0x34] sm:$0xf0]  ;;  %v528_v13 = vld [vmem:[%s756_s1 + $0x2c] sm:$0xf]  ;;  %v425_v14 = vor.u32 %v523_v8, %v422_v9  ;;  %v446_v16 = vld [vmem:[%s756_s1 + $0x38] sm:$0xf0] }
   0x5   :  { %102 = vmatpush.bf16.msra.mxu3 %v441_v7  ;;  %v445_v15 = vor.u32 %v530_v12, %v444_v11  ;;  %v449_v17 = vor.u32 %v528_v13, %v446_v16  ;;  %v428_v18 = vld [vmem:[%s756_s1 + $0x8] sm:$0xf]  ;;  %v526_v19 = vld [vmem:[%s756_s1 + $0x14] sm:$0xf0] }
   0x6   :  { %8 = vsyncpa [#allocation4], 0  ;;  %v522_v20 = vld [vmem:[%s755_s0] sm:$0xff]  ;;  %v524_v21 = vld [vmem:[%s756_s1 + $0xc] sm:$0xf]  ;;  %vm20_vm0 = vcmask 261120   ;;  %v429_v23 = vor.u32 %v526_v19, %v428_v18 }
   0x7   :  { %v430_v22 = vld [vmem:[%s756_s1 + $0x18] sm:$0xf0]  ;;  %v537_v27 = vld [vmem:[%s757_s2 + $0x30] sm:$0xff]  ;;  %v536_v29 = vld [vmem:[%s757_s2 + $0x28] sm:$0xff]  ;;  %s402_s23 = sshll.u32 %s758_s3, 4  ;;  %s595_s24 = smov 64   ;;  %s403_s23 = int_to_ptr.hbm [resolvable:$true] %s402_s23 }
   0x8   :  { %89 = vmatpush.bf16.msra.mxu2 %v421_v10  ;;  %v433_v24 = vor.u32 %v524_v21, %v430_v22  ;;  %v538_v25 = vld [vmem:[%s757_s2 + $0x38] sm:$0xff]  ;;  %v545_v28 = vld [vmem:[%s757_s2 + $0x70] sm:$0xff]  ;;  %v544_v30 = vld [vmem:[%s757_s2 + $0x68] sm:$0xff]  ;;  %s596_s25 = smov 4  }
   0x9   :  { %103 = vmatpush.bf16.msra.mxu3 %v425_v14  ;;  %v546_v26 = vld [vmem:[%s757_s2 + $0x78] sm:$0xff]  ;;  %354 = vmatpush.bf16.msra.mxu0 %v538_v25  ;;  %v535_v31 = vld [vmem:[%s757_s2 + $0x20] sm:$0xff]  ;;  %v533_v39 = vld [vmem:[%s757_s2 + $0x10] sm:$0xff] }
   0xa   :  { %368 = vmatpush.bf16.msra.mxu1 %v546_v26  ;;  %v543_v32 = vld [vmem:[%s757_s2 + $0x60] sm:$0xff]  ;;  %v534_v33 = vld [vmem:[%s757_s2 + $0x18] sm:$0xff]  ;;  %v541_v40 = vld [vmem:[%s757_s2 + $0x50] sm:$0xff] }
   0xb   :  { %450 = vmatmul.msk.bf16.vlgmr.msra.gmra.mxu2 %vm20_vm0, %v522_v20  ;;  %v542_v34 = vld [vmem:[%s757_s2 + $0x58] sm:$0xff]  ;;  %v532_v41 = vld [vmem:[%s757_s2 + $0x8] sm:$0xff]  ;;  %v531_v50 = vld [vmem:[%s757_s2] sm:$0xff] }
   0xc   :  { %116 = vmatpush.bf16.msrb.mxu2 %v445_v15  ;;  %451 = vmatmul.msk.bf16.vlgmr.msra.gmra.mxu3 %vm20_vm0, %v522_v20  ;;  %v540_v42 = vld [vmem:[%s757_s2 + $0x48] sm:$0xff]  ;;  %v539_v51 = vld [vmem:[%s757_s2 + $0x40] sm:$0xff]  ;;  %s594_s2 = smov [#allocation3]  }
   0xd   :  { %130 = vmatpush.bf16.msrb.mxu3 %v449_v17  ;;  %355 = vmatpush.bf16.msra.mxu0 %v537_v27  ;;  %s400_s20 = sshll.u32 %s594_s2, 4  ;;  %s401_s20 = int_to_ptr.vmem [resolvable:$true] %s400_s20 }
   0xe   :  { %369 = vmatpush.bf16.msra.mxu1 %v545_v28 }
  0x10   :  { %117 = vmatpush.bf16.msrb.mxu2 %v429_v23 }
  0x11   :  { %131 = vmatpush.bf16.msrb.mxu3 %v433_v24  ;;  %356 = vmatpush.bf16.msra.mxu0 %v536_v29 }
  0x12   :  { %370 = vmatpush.bf16.msra.mxu1 %v544_v30 }
  0x15   :  { %357 = vmatpush.bf16.msra.mxu0 %v535_v31 }
  0x16   :  { %371 = vmatpush.bf16.msra.mxu1 %v543_v32 }
  0x19   :  { %358 = vmatpush.bf16.msra.mxu0 %v534_v33 }
  0x1a   :  { %372 = vmatpush.bf16.msra.mxu1 %v542_v34 }
  0x1b   :  { %452 = vmatmul.msk.bf16.vlgmr.msrb.gmra.mxu2 %vm20_vm0, %v522_v20 }
  0x1c   :  { %453 = vmatmul.msk.bf16.vlgmr.msrb.gmra.mxu3 %vm20_vm0, %v522_v20 }
  0x1d   :  { %359 = vmatpush.bf16.msra.mxu0 %v533_v39 }
  0x1e   :  { %373 = vmatpush.bf16.msra.mxu1 %v541_v40 }
  0x21   :  { %360 = vmatpush.bf16.msra.mxu0 %v532_v41 }
  0x22   :  { %374 = vmatpush.bf16.msra.mxu1 %v540_v42 }
  0x25   :  { %361 = vmatpush.bf16.msra.mxu0 %v531_v50 }
  0x26   :  { %375 = vmatpush.bf16.msra.mxu1 %v539_v51 }
  0x8e   :  { %v702_v35 = vpop.f32.mrf.mxu2 }
  0x8f   :  { %v454_v36 = vmul.f32 -1.442695, %v702_v35  ;;  %v705_v37 = vpop.f32.mrf.mxu3 }
  0x90   :  { %v455_v38 = vmul.f32 -1.442695, %v705_v37 }
  0x91   :  { %551 = vpow2.f32 %v454_v36 }
  0x92   :  { %553 = vpow2.f32 %v455_v38 }
  0x96   :  { %v720_v43 = vpop.f32.mrf.mxu2 }
  0x97   :  { %v552_v44 = vpop.eup %551  ;;  %v456_v45 = vmul.f32 -1.442695, %v720_v43  ;;  %v723_v46 = vpop.f32.mrf.mxu3 }
  0x98   :  { %v554_v47 = vpop.eup %553  ;;  %v150_v48 = vadd.f32 1.0, %v552_v44  ;;  %v457_v49 = vmul.f32 -1.442695, %v723_v46 }
  0x99   :  { %v151_v52 = vadd.f32 1.0, %v554_v47  ;;  %555 = vpow2.f32 %v456_v45 }
  0x9a   :  { %557 = vrcp.f32 %v150_v48  ;;  %v165_v3 = vand.u32 2147483648, %v150_v48  ;;  %vm159_vm2 = vweird.f32 %v150_v48  ;;  %v163_v4 = vand.u32 2147483647, %v150_v48 }
  0x9b   :  { %559 = vrcp.f32 %v151_v52  ;;  %v178_v8 = vand.u32 2147483647, %v151_v52  ;;  %v180_v12 = vand.u32 2147483648, %v151_v52  ;;  %vm174_vm5 = vweird.f32 %v151_v52 }
  0x9c   :  { %561 = vpow2.f32 %v457_v49  ;;  %v166_v14 = vor.u32 1.1754944e-38, %v165_v3  ;;  %vm164_vm6 = vcmp.eq.f32.partialorder %v163_v4, 8.507059e+37 }
  0x9d   :  { %vm179_vm9 = vcmp.eq.f32.partialorder %v178_v8, 8.507059e+37  ;;  %v181_v24 = vor.u32 1.1754944e-38, %v180_v12 }
  0x9e   :  { %v119_v9 = vpop.f32.mrf.mxu2 }
  0x9f   :  { %v556_v53 = vpop.eup %555  ;;  %v133_v20 = vpop.f32.mrf.mxu3 }
  0xa0   :  { %v558_v54 = vpop.eup %557  ;;  %v152_v55 = vadd.f32 1.0, %v556_v53 }
  0xa1   :  { %v560_v56 = vpop.eup %559  ;;  %v155_v57 = vmul.f32 %v558_v54, %v150_v48  ;;  %vm160_vm1 = vweird.f32 %v558_v54 }
  0xa2   :  { %v562_v58 = vpop.eup %561  ;;  %v170_v59 = vmul.f32 %v560_v56, %v151_v52  ;;  %563 = vrcp.f32 %v152_v55  ;;  %vm732_vm3 = vmor %vm159_vm2, %vm160_vm1  ;;  %vm175_vm4 = vweird.f32 %v560_v56  ;;  %v195_v15 = vand.u32 2147483648, %v152_v55 }
  0xa3   :  { %v156_v60 = vsub.f32 1.0, %v155_v57  ;;  %v153_v61 = vadd.f32 1.0, %v562_v58  ;;  %vm738_vm7 = vmor %vm174_vm5, %vm175_vm4  ;;  %v193_v19 = vand.u32 2147483647, %v152_v55  ;;  %vm189_vm10 = vweird.f32 %v152_v55 }
  0xa4   :  { %v171_v62 = vsub.f32 1.0, %v170_v59  ;;  %v196_v27 = vor.u32 1.1754944e-38, %v195_v15  ;;  %vm393_vm2 = vcmask 257024  }
  0xa5   :  { %v157_v63 = vmul.f32 %v558_v54, %v156_v60  ;;  %565 = vrcp.f32 %v153_v61  ;;  %v210_v26 = vand.u32 2147483648, %v153_v61  ;;  %v208_v29 = vand.u32 2147483647, %v153_v61 }
  0xa6   :  { %v172_v0 = vmul.f32 %v560_v56, %v171_v62  ;;  %vm194_vm13 = vcmp.eq.f32.partialorder %v193_v19, 8.507059e+37  ;;  %vm204_vm14 = vweird.f32 %v153_v61  ;;  %v121_v41 = vpop.f32.mrf.mxu2 }
  0xa7   :  { %v158_v1 = vadd.f32 %v558_v54, %v157_v63  ;;  %v211_v38 = vor.u32 1.1754944e-38, %v210_v26  ;;  %vm209_vm1 = vcmp.eq.f32.partialorder %v208_v29, 8.507059e+37  ;;  %v135_v47 = vpop.f32.mrf.mxu3 }
  0xa8   :  { %v564_v2 = vpop.eup %563  ;;  %v173_v7 = vadd.f32 %v560_v56, %v172_v0 }
  0xa9   :  { %v185_v5 = vmul.f32 %v564_v2, %v152_v55  ;;  %v162_v11 = vsel %vm732_vm3, %v558_v54, %v158_v1  ;;  %vm190_vm8 = vweird.f32 %v564_v2 }
  0xaa   :  { %v167_v21 = vsel %vm164_vm6, %v166_v14, %v162_v11  ;;  %v177_v22 = vsel %vm738_vm7, %v560_v56, %v173_v7  ;;  %vm191_vm11 = vmor %vm189_vm10, %vm190_vm8 }
  0xab   :  { %v566_v10 = vpop.eup %565  ;;  %v186_v13 = vsub.f32 1.0, %v185_v5  ;;  %v214_v30 = vmul.f32 %v167_v21, %v702_v35  ;;  %v182_v31 = vsel %vm179_vm9, %v181_v24, %v177_v22 }
  0xac   :  { %v200_v16 = vmul.f32 %v566_v10, %v153_v61  ;;  %vm205_vm12 = vweird.f32 %v566_v10  ;;  %v215_v39 = vmul.f32 %v182_v31, %v705_v37 }
  0xad   :  { %v187_v18 = vmul.f32 %v564_v2, %v186_v13  ;;  %vm206_vm15 = vmor %vm204_vm14, %vm205_vm12  ;;  %v218_v44 = vmul.f32 %v214_v30, %v119_v9 }
  0xae   :  { %v201_v23 = vsub.f32 1.0, %v200_v16  ;;  %v219_v49 = vmul.f32 %v215_v39, %v133_v20 }
  0xaf   :  { %v188_v25 = vadd.f32 %v564_v2, %v187_v18 }
  0xb0   :  { %v202_v28 = vmul.f32 %v566_v10, %v201_v23 }
  0xb1   :  { %v192_v32 = vsel %vm191_vm11, %v564_v2, %v188_v25 }
  0xb2   :  { %v197_v33 = vsel %vm194_vm13, %v196_v27, %v192_v32  ;;  %v203_v34 = vadd.f32 %v566_v10, %v202_v28 }
  0xb3   :  { %v216_v36 = vmul.f32 %v197_v33, %v720_v43  ;;  %v593_v43 = vmov 0.0  }
  0xb4   :  { %v207_v40 = vsel %vm206_vm15, %v566_v10, %v203_v34  ;;  %21 = vst.msk [vmem:[#allocation2] sm:$0xff] %vm20_vm0, %v593_v43 }
  0xb5   :  { %v212_v42 = vsel %vm209_vm1, %v211_v38, %v207_v40  ;;  %v220_v45 = vmul.f32 %v216_v36, %v121_v41  ;;  %22 = vst.msk [vmem:[#allocation2 + $0x8] sm:$0xff] %vm20_vm0, %v593_v43 }
  0xb6   :  { %v217_v35 = vmul.f32 %v212_v42, %v723_v46 }
  0xb7   :  { %v224_v48 = vpack.c.bf16 %v220_v45, %v218_v44 }
  0xb8   :  { %v221_v50 = vmul.f32 %v217_v35, %v135_v47 }
  0xb9   :  { %362 = vmatmul.bf16.vlgmr.msra.gmra.mxu0 %v224_v48 }
  0xba   :  { %v225_v51 = vpack.c.bf16 %v221_v50, %v219_v49 }
  0xbb   :  { %v222_v52 = vld [vmem:[#allocation2] sm:$0xff] }
  0xbc   :  { %376 = vmatmul.bf16.vlgmr.msra.gmra.mxu1 %v225_v51  ;;  %v223_v56 = vld [vmem:[#allocation2 + $0x8] sm:$0xff] }
 0x136   :  { %v363_v37 = vpop.f32.mrf.mxu0 }
 0x139   :  { %v377_v53 = vpop.f32.mrf.mxu1 }
 0x13a   :  { %v378_v54 = vadd.f32 %v377_v53, %v363_v37 }
 0x13c   :  { %v382_v55 = vadd.f32 %v378_v54, %v222_v52 }
 0x13e   :  { %384 = vst.msk [vmem:[#allocation2] sm:$0xff] %vm20_vm0, %v382_v55  ;;  %v365_v46 = vpop.f32.mrf.mxu0 }
 0x141   :  { %v379_v57 = vpop.f32.mrf.mxu1 }
 0x142   :  { %v380_v58 = vadd.f32 %v379_v57, %v365_v46 }
 0x144   :  { %v383_v59 = vadd.f32 %v380_v58, %v223_v56 }
 0x145   :  { %v389_v60 = vld [vmem:[#allocation2] sm:$0xff] }
 0x146   :  { %385 = vst.msk [vmem:[#allocation2 + $0x8] sm:$0xff] %vm20_vm0, %v383_v59  ;;  %v391_v61 = vpack.c.bf16 %v389_v60, %v389_v60 }
 0x148   :  { %394 = vst.msk [vmem:[#allocation3] sm:$0xf] %vm393_vm2, %v391_v61 }
 0x14d   :  { %v390_v62 = vld [vmem:[#allocation2 + $0x8] sm:$0xff] }
 0x14e   :  { %v392_v63 = vpack.c.bf16 %v390_v62, %v390_v62 }
 0x150   :  { %395 = vst.msk [vmem:[#allocation3 + $0x4] sm:$0xf] %vm393_vm2, %v392_v63 }
 0x151   :  { %408 = dma.vmem_to_hbm [thread:$0]  %s401_s20, 128, %s403_s23, [#allocation4], %s595_s24, %s595_s24, %s596_s25  }
 0x152   :  { %591 = dma.done.wait [#allocation4], 128  }
 0x153   :  { %592 = vsyncadd [#allocation4], 4294967168 }
 0x154   :  { %413 = vsyncpa [#allocation4], 1 }

</bundles_post_ra>
